<compile_context>
chip_gen: v7x
topology: tpu7x:2x2x1
jax: 0.10.0
libtpu: 0.0.40
codegen_flags: <defaults>
</compile_context>

<pallas_src>
import functools

import jax
import jax.numpy as jnp
from jax.experimental import pallas as pl
from jax.experimental.pallas import tpu as pltpu

LANE = 128
SUBLANE = 8
MAX_BLOCK_ROWS = 2048   # (2048, 128) f32 = 1 MiB/block; 2 inputs x 2 buffers = 4 MiB VMEM
PAD_LOGIT = -100.0      # sigmoid(-100) ~ 0, with target 0 -> focal_w = 0 and bce = 0 exactly


def _focal_loss_kernel(x_ref, t_ref, part_ref, *, alpha, gamma, eps):
    x = x_ref[...].astype(jnp.float32)
    t = t_ref[...].astype(jnp.float32)

    probs = jax.nn.sigmoid(x)
    pt = t * probs + (1.0 - t) * (1.0 - probs)
    one_minus_pt = 1.0 - pt
    if gamma == 2.0:
        focal_w = one_minus_pt * one_minus_pt      # exact, avoids pow -> exp(g*log) on EUP
    elif gamma == 1.0:
        focal_w = one_minus_pt
    else:
        focal_w = one_minus_pt ** gamma
    alpha_t = alpha * t + (1.0 - alpha) * (1.0 - t)
    # Same clamped-log formulation as the PyTorch module (keeps forward semantics).
    bce = -alpha_t * (
        t * jnp.log(jnp.maximum(probs, eps))
        + (1.0 - t) * jnp.log(jnp.maximum(1.0 - probs, eps))
    )
    loss = focal_w * bce

    # Fold the (block_rows, 128) block into a single (8, 128) vreg with VPU adds only;
    # the cross-lane reduction happens once, outside the kernel.
    part_ref[...] = loss.reshape(-1, SUBLANE, LANE).sum(axis=0)


def focal_loss(inputs, targets, *, alpha=0.75, gamma=2.0, eps=1e-6):
    """JAX/Pallas equivalent of FocalLoss(alpha, gamma).forward(inputs, targets)."""
    if targets.ndim == 3:
        targets = targets[:, None, :, :]               # unsqueeze(1)
    if targets.shape != inputs.shape:
        targets = jnp.broadcast_to(targets, inputs.shape)

    n = inputs.size
    x = inputs.reshape(-1)
    t = targets.reshape(-1)                            # keep original (possibly narrow) dtype

    # Choose a block size: near-equal blocks of at most MAX_BLOCK_ROWS rows, rows % 8 == 0.
    rows8 = pl.cdiv(pl.cdiv(n, LANE), SUBLANE) * SUBLANE
    num_blocks = pl.cdiv(rows8, MAX_BLOCK_ROWS)
    block_rows = pl.cdiv(pl.cdiv(rows8, num_blocks), SUBLANE) * SUBLANE
    rows = num_blocks * block_rows

    pad = rows * LANE - n
    # TODO(synk): handle the ragged tail in-kernel (scalar-prefetched n + iota mask) to
    # avoid this pad copy entirely.
    if pad:
        x = jnp.pad(x, (0, pad), constant_values=PAD_LOGIT)
        t = jnp.pad(t, (0, pad))                       # pads with 0 in targets' dtype

    x2 = x.reshape(rows, LANE)
    t2 = t.reshape(rows, LANE)

    kernel = functools.partial(
        _focal_loss_kernel, alpha=float(alpha), gamma=float(gamma), eps=float(eps)
    )

    partials = pl.pallas_call(
        kernel,
        out_shape=jax.ShapeDtypeStruct((num_blocks * SUBLANE, LANE), jnp.float32),
        grid_spec=pltpu.PrefetchScalarGridSpec(
            num_scalar_prefetch=0,
            grid=(num_blocks,),
            in_specs=[
                pl.BlockSpec((block_rows, LANE), lambda i: (i, 0)),
                pl.BlockSpec((block_rows, LANE), lambda i: (i, 0)),
            ],
            out_specs=pl.BlockSpec((SUBLANE, LANE), lambda i: (i, 0)),
        ),
        compiler_params=pltpu.CompilerParams(
            dimension_semantics=("parallel",),
        ),
    )(x2, t2)

    return jnp.sum(partials) / jnp.float32(n)


def _focal_loss_ref(inputs, targets, alpha=0.75, gamma=2.0, eps=1e-6):
    if targets.ndim == 3:
        targets = targets[:, None, :, :]
    targets = targets.astype(jnp.float32)
    probs = jax.nn.sigmoid(inputs.astype(jnp.float32))
    pt = targets * probs + (1 - targets) * (1 - probs)
    focal_w = (1 - pt) ** gamma
    alpha_t = alpha * targets + (1 - alpha) * (1 - targets)
    bce = -alpha_t * (
        targets * jnp.log(jnp.maximum(probs, eps))
        + (1 - targets) * jnp.log(jnp.maximum(1 - probs, eps))
    )
    return jnp.mean(focal_w * bce)


if __name__ == "__main__":
    key = jax.random.PRNGKey(0)
    k1, k2 = jax.random.split(key)
    # Typical binary-segmentation usage: logits (N, 1, H, W), targets (N, H, W).
    N, C, H, W = 2, 1, 16, 16
    logits = jax.random.normal(k1, (N, C, H, W), dtype=jnp.float32) * 2.0
    targets = (jax.random.uniform(k2, (N, H, W)) > 0.5).astype(jnp.float32)

    loss = focal_loss(logits, targets, alpha=0.75, gamma=2.0)
    loss = jax.block_until_ready(loss)

    ref = _focal_loss_ref(logits, targets, alpha=0.75, gamma=2.0)
    assert jnp.allclose(loss, ref, rtol=1e-5, atol=1e-6), (loss, ref)

    print("KERNEL_OK")
</pallas_src>

<mosaic_0001>
module attributes {stable_mosaic.version = 11 : i64} {
  func.func @_focal_loss_kernel(%arg0: i32, %arg1: memref<8x128xf32, #tpu.memory_space<vmem>>, %arg2: memref<8x128xf32, #tpu.memory_space<vmem>>, %arg3: memref<8x128xf32, #tpu.memory_space<vmem>>) attributes {dimension_semantics = [#tpu.dimension_semantics<parallel>], iteration_bounds = array<i64: 1>, scalar_prefetch = 0 : i64, scratch_operands = 0 : i64, tpu.core_type = #tpu.core_type<tc>, window_params = [{transform_indices = @transform_0, window_bounds = array<i64: 8, 128>}, {transform_indices = @transform_1, window_bounds = array<i64: 8, 128>}, {transform_indices = @transform_2, window_bounds = array<i64: 8, 128>}]} {
    %c0 = arith.constant 0 : index
    %c0_0 = arith.constant 0 : index
    %0 = vector.load %arg1[%c0, %c0_0] : memref<8x128xf32, #tpu.memory_space<vmem>>, vector<8x128xf32>
    %c0_1 = arith.constant 0 : index
    %c0_2 = arith.constant 0 : index
    %1 = vector.load %arg2[%c0_1, %c0_2] : memref<8x128xf32, #tpu.memory_space<vmem>>, vector<8x128xf32>
    %2 = arith.negf %0 : vector<8x128xf32>
    %3 = math.exp %2 : vector<8x128xf32>
    %cst = arith.constant 1.000000e+00 : f32
    %4 = vector.broadcast %cst : f32 to vector<8x128xf32>
    %5 = arith.addf %4, %3 : vector<8x128xf32>
    %6 = arith.divf %4, %5 : vector<8x128xf32>
    %7 = arith.mulf %1, %6 : vector<8x128xf32>
    %cst_3 = arith.constant 1.000000e+00 : f32
    %8 = vector.broadcast %cst_3 : f32 to vector<8x128xf32>
    %9 = arith.subf %8, %1 : vector<8x128xf32>
    %cst_4 = arith.constant 1.000000e+00 : f32
    %10 = vector.broadcast %cst_4 : f32 to vector<8x128xf32>
    %11 = arith.subf %10, %6 : vector<8x128xf32>
    %12 = arith.mulf %9, %11 : vector<8x128xf32>
    %13 = arith.addf %7, %12 : vector<8x128xf32>
    %cst_5 = arith.constant 1.000000e+00 : f32
    %14 = vector.broadcast %cst_5 : f32 to vector<8x128xf32>
    %15 = arith.subf %14, %13 : vector<8x128xf32>
    %16 = arith.mulf %15, %15 : vector<8x128xf32>
    %cst_6 = arith.constant 7.500000e-01 : f32
    %17 = vector.broadcast %cst_6 : f32 to vector<8x128xf32>
    %18 = arith.mulf %17, %1 : vector<8x128xf32>
    %cst_7 = arith.constant 1.000000e+00 : f32
    %19 = vector.broadcast %cst_7 : f32 to vector<8x128xf32>
    %20 = arith.subf %19, %1 : vector<8x128xf32>
    %cst_8 = arith.constant 2.500000e-01 : f32
    %21 = vector.broadcast %cst_8 : f32 to vector<8x128xf32>
    %22 = arith.mulf %21, %20 : vector<8x128xf32>
    %23 = arith.addf %18, %22 : vector<8x128xf32>
    %cst_9 = arith.constant 0.000000e+00 : f32
    %24 = vector.broadcast %cst_9 : f32 to vector<8x128xf32>
    %25 = arith.subf %24, %23 : vector<8x128xf32>
    %cst_10 = arith.constant 9.99999997E-7 : f32
    %26 = vector.broadcast %cst_10 : f32 to vector<8x128xf32>
    %27 = arith.maximumf %6, %26 : vector<8x128xf32>
    %28 = math.log %27 : vector<8x128xf32>
    %29 = arith.mulf %1, %28 : vector<8x128xf32>
    %cst_11 = arith.constant 1.000000e+00 : f32
    %30 = vector.broadcast %cst_11 : f32 to vector<8x128xf32>
    %31 = arith.subf %30, %1 : vector<8x128xf32>
    %cst_12 = arith.constant 1.000000e+00 : f32
    %32 = vector.broadcast %cst_12 : f32 to vector<8x128xf32>
    %33 = arith.subf %32, %6 : vector<8x128xf32>
    %cst_13 = arith.constant 9.99999997E-7 : f32
    %34 = vector.broadcast %cst_13 : f32 to vector<8x128xf32>
    %35 = arith.maximumf %33, %34 : vector<8x128xf32>
    %36 = math.log %35 : vector<8x128xf32>
    %37 = arith.mulf %31, %36 : vector<8x128xf32>
    %38 = arith.addf %29, %37 : vector<8x128xf32>
    %39 = arith.mulf %25, %38 : vector<8x128xf32>
    %40 = arith.mulf %16, %39 : vector<8x128xf32>
    %41 = vector.shape_cast %40 : vector<8x128xf32> to vector<1x8x128xf32>
    %cst_14 = arith.constant dense<0.000000e+00> : vector<8x128xf32>
    %42 = vector.multi_reduction <add>, %41, %cst_14 [0] : vector<1x8x128xf32> to vector<8x128xf32>
    %c0_15 = arith.constant 0 : index
    %c0_16 = arith.constant 0 : index
    %43 = vector.load %arg3[%c0_15, %c0_16] : memref<8x128xf32, #tpu.memory_space<vmem>>, vector<8x128xf32>
    tpu.vector_store %arg3[%c0_15, %c0_16], %42 {strides = array<i32>} : memref<8x128xf32, #tpu.memory_space<vmem>>, vector<8x128xf32>,
    return
  }
  func.func @transform_0(%arg0: i32) -> (i32, i32) {
    %c0_i32 = arith.constant 0 : i32
    %c0_i32_0 = arith.constant 0 : i32
    return %arg0, %c0_i32 : i32, i32
  }
  func.func @transform_1(%arg0: i32) -> (i32, i32) {
    %c0_i32 = arith.constant 0 : i32
    %c0_i32_0 = arith.constant 0 : i32
    return %arg0, %c0_i32 : i32, i32
  }
  func.func @transform_2(%arg0: i32) -> (i32, i32) {
    %c0_i32 = arith.constant 0 : i32
    %c0_i32_0 = arith.constant 0 : i32
    return %arg0, %c0_i32 : i32, i32
  }
}

</mosaic_0001>

<bundles_post_ra>
// kernel: tpu_custom_call.1
= control target key start
LH: loop header
LB: loop body
LE: loop exit
PB: predicated region body
PF: predicated region fallthrough
CT: control target
= control target key end

     0   :  { %7 = vsyncpa [#allocation3], 0  ;;  %s222_s0 = inlined_call_operand.hbm [shape: f32[8,128], index: 0, kind: input, shape index: {}]   ;;  %s223_s1 = inlined_call_operand.hbm [shape: f32[8,128], index: 1, kind: input, shape index: {}]   ;;  %s224_s2 = inlined_call_operand.hbm [shape: f32[8,128], index: 2, kind: output, shape index: {}]  }
   0x1   :  { %8 = vsyncpa [#allocation6], 0 }
   0x2   :  { %9 = vsyncpa [#allocation4], 0  ;;  %s168_s9 = smov [#allocation2]   ;;  %s169_s11 = smov [#allocation5]  }
   0x3   :  { %s16_s10 = sshll.u32 %s168_s9, 4  ;;  %s26_s12 = sshll.u32 %s169_s11, 4  ;;  %s17_s10 = int_to_ptr.vmem [resolvable:$true] %s16_s10  ;;  %s27_s12 = int_to_ptr.vmem [resolvable:$true] %s26_s12 }
   0x4   :  { %s96_s15 = scalar_lea.hbm %s222_s0, 128 }
   0x5   :  { %p97_p0 = scmp.ne.s32.totalorder %s222_s0, %s96_s15  ;;  %p100_p1 = scmp.lt.u32.totalorder %s96_s15, %s222_s0 }
   0x7   :  { %p102_p2 = pnand %p100_p1, %p97_p0 }
   0x9   :  { %105 = shalt.err (!%p102_p2)
}
   0xa   :  { %s106_s20 = scalar_lea.vmem %s17_s10, 128  ;;  %p111_p4 = scmp.lt.s32.totalorder %s17_s10, %s17_s10 }
   0xb   :  { %p107_p3 = scmp.ne.s32.totalorder %s17_s10, %s106_s20  ;;  %p112_p5 = scmp.lt.s32.totalorder %s106_s20, %s106_s20 }
   0xd   :  { %p113_p6 = por %p112_p5, %p111_p4 }
   0xf   :  { %p114_p7 = pnand %p113_p6, %p107_p3 }
  0x11   :  { %117 = shalt.err (!%p114_p7)
}
  0x12   :  { %19 = dma.hbm_to_vmem [thread:$0]  %s222_s0, 128, %s17_s10, [#allocation3]  }
  0x13   :  { %s118_s25 = scalar_lea.hbm %s223_s1, 128 }
  0x14   :  { %p119_p8 = scmp.ne.s32.totalorder %s223_s1, %s118_s25  ;;  %p122_p9 = scmp.lt.u32.totalorder %s118_s25, %s223_s1 }
  0x16   :  { %p124_p10 = pnand %p122_p9, %p119_p8 }
  0x18   :  { %127 = shalt.err (!%p124_p10)
}
  0x19   :  { %s128_s30 = scalar_lea.vmem %s27_s12, 128  ;;  %p133_p12 = scmp.lt.s32.totalorder %s27_s12, %s27_s12 }
  0x1a   :  { %p129_p11 = scmp.ne.s32.totalorder %s27_s12, %s128_s30  ;;  %p134_p13 = scmp.lt.s32.totalorder %s128_s30, %s128_s30 }
  0x1c   :  { %p135_p0 = por %p134_p13, %p133_p12 }
  0x1e   :  { %p136_p1 = pnand %p135_p0, %p129_p11 }
  0x20   :  { %139 = shalt.err (!%p136_p1)
}
  0x21   :  { %29 = dma.hbm_to_vmem [thread:$0]  %s223_s1, 128, %s27_s12, [#allocation6]  }
  0x22   :  { %162 = dma.done.wait [#allocation3], 128  }
  0x23   :  { %163 = vsyncadd [#allocation3], 4294967168 }
  0x24   :  { %164 = dma.done.wait [#allocation6], 128  }
  0x25   :  { %165 = vsyncadd [#allocation6], 4294967168  ;;  %v36_v0 = vld [vmem:[#allocation2] sm:$0xff]  ;;  %v37_v5 = vld [vmem:[#allocation5] sm:$0xff]  ;;  %s170_s1 = smov [#allocation7]  }
  0x26   :  { %v84_v1 = vmul.f32 -1.442695, %v36_v0  ;;  %v45_v9 = vsub.f32 1.0, %v37_v5  ;;  %v51_v12 = vmul.f32 0.75, %v37_v5  ;;  %s74_s4 = sshll.u32 %s170_s1, 4  ;;  %s75_s4 = int_to_ptr.vmem [resolvable:$true] %s74_s4 }
  0x27   :  { %s140_s5 = scalar_lea.vmem %s75_s4, 128  ;;  %p145_p3 = scmp.lt.s32.totalorder %s75_s4, %s75_s4 }
  0x28   :  { %88 = vpow2.f32 %v84_v1  ;;  %v52_v13 = vmul.f32 0.25, %v45_v9  ;;  %p141_p2 = scmp.ne.s32.totalorder %s75_s4, %s140_s5  ;;  %p146_p4 = scmp.lt.s32.totalorder %s140_s5, %s140_s5 }
  0x2a   :  { %v53_v16 = vadd.f32 %v52_v13, %v51_v12  ;;  %p147_p5 = por %p146_p4, %p145_p3 }
  0x2c   :  { %v54_v22 = vsub.f32 0.0, %v53_v16  ;;  %p148_p6 = pnand %p147_p5, %p141_p2 }
  0x32   :  { %v89_v2 = vpop.eup %88 }
  0x33   :  { %v41_v3 = vadd.f32 1.0, %v89_v2 }
  0x35   :  { %90 = vrcp.f32 %v41_v3 }
  0x3f   :  { %v91_v4 = vpop.eup %90 }
  0x40   :  { %v46_v6 = vsub.f32 1.0, %v91_v4  ;;  %v55_v7 = vmax.f32 %v91_v4, 1e-06  ;;  %v44_v10 = vmul.f32 %v91_v4, %v37_v5 }
  0x42   :  { %92 = vlog2.f32 %v55_v7  ;;  %v59_v8 = vmax.f32 %v46_v6, 1e-06  ;;  %v47_v11 = vmul.f32 %v46_v6, %v45_v9 }
  0x44   :  { %94 = vlog2.f32 %v59_v8  ;;  %v48_v14 = vadd.f32 %v47_v11, %v44_v10 }
  0x46   :  { %v49_v19 = vsub.f32 1.0, %v48_v14 }
  0x48   :  { %v50_v24 = vmul.f32 %v49_v19, %v49_v19 }
  0x4c   :  { %v93_v15 = vpop.eup %92 }
  0x4d   :  { %v57_v17 = vmul.f32 0.6931472, %v93_v15 }
  0x4e   :  { %v95_v18 = vpop.eup %94 }
  0x4f   :  { %v58_v20 = vmul.f32 %v57_v17, %v37_v5  ;;  %v61_v21 = vmul.f32 0.6931472, %v95_v18 }
  0x51   :  { %v62_v23 = vmul.f32 %v61_v21, %v45_v9 }
  0x53   :  { %v63_v25 = vadd.f32 %v62_v23, %v58_v20 }
  0x55   :  { %v64_v26 = vmul.f32 %v63_v25, %v54_v22 }
  0x57   :  { %v65_v27 = vmul.f32 %v64_v26, %v50_v24 }
  0x59   :  { %67 = vst [vmem:[#allocation7] sm:$0xff] %v65_v27 }
  0x5a   :  { %151 = shalt.err (!%p148_p6)
}
  0x5b   :  { %s152_s8 = scalar_lea.hbm %s224_s2, 128 }
  0x5c   :  { %p153_p7 = scmp.ne.s32.totalorder %s224_s2, %s152_s8  ;;  %p156_p8 = scmp.lt.u32.totalorder %s152_s8, %s224_s2 }
  0x5e   :  { %p158_p9 = pnand %p156_p8, %p153_p7 }
  0x60   :  { %161 = shalt.err (!%p158_p9)
}
  0x61   :  { %77 = dma.vmem_to_hbm [thread:$0]  %s75_s4, 128, %s224_s2, [#allocation4]  }
  0x62   :  { %166 = dma.done.wait [#allocation4], 128  }
  0x63   :  { %167 = vsyncadd [#allocation4], 4294967168 }
  0x64   :  { %81 = vsyncpa [#allocation3], 1 }
  0x65   :  { %82 = vsyncpa [#allocation6], 1 }
  0x66   :  { %83 = vsyncpa [#allocation4], 1 }

</bundles_post_ra>
